<compile_context>
chip_gen: v6e
topology: v6e:2x2x1
jax: 0.10.0
libtpu: 0.0.40
codegen_flags: <defaults>
</compile_context>

<pallas_src>
import functools

import jax
import jax.numpy as jnp
from jax.experimental import pallas as pl
from jax.experimental.pallas import tpu as pltpu


# ---------------------------------------------------------------------------
# In-kernel helpers
# ---------------------------------------------------------------------------

def _ce_rows(logits, tgt):
    """Per-row cross-entropy without materializing the full log-softmax.

    ce_row = logsumexp(shifted) - shifted[target], shifted = logits - rowmax.
    Returns (ce_row, shifted, lse) so the T==1 KL path can reuse shifted/lse.
    """
    m = jnp.max(logits, axis=-1, keepdims=True)
    shifted = logits - m
    lse = jnp.log(jnp.sum(jnp.exp(shifted), axis=-1, keepdims=True))     # (TB,1)
    col_ids = jax.lax.broadcasted_iota(jnp.int32, logits.shape, 1)
    sel = jnp.sum(jnp.where(col_ids == tgt, shifted, 0.0),
                  axis=-1, keepdims=True)                                # (TB,1)
    return lse - sel, shifted, lse


def _row_valid_mask(tile_b, batch_size):
    i = pl.program_id(0)
    row_ids = i * tile_b + jax.lax.broadcasted_iota(jnp.int32, (tile_b, 1), 0)
    return row_ids < batch_size


# ---------------------------------------------------------------------------
# Kernels
# ---------------------------------------------------------------------------

def _distill_kernel(logits_ref, targets_ref, teacher_ref, out_ref, acc_ref, *,
                    alpha, temperature, batch_size, tile_b, need_mask):
    i = pl.program_id(0)

    @pl.when(i == 0)
    def _():
        acc_ref[0, 0] = jnp.float32(0.0)

    logits = logits_ref[...].astype(jnp.float32)        # (TB, C)
    tgt = targets_ref[...]                              # (TB, 1) int32

    ce_row, shifted, lse = _ce_rows(logits, tgt)        # (TB, 1) each

    # Student log-softmax at temperature T; reuse the CE pass when T == 1
    # (temperature is a Python float at trace time).
    if temperature == 1.0:
        s_lsm = shifted - lse
    else:
        t_logits = logits * (1.0 / temperature)
        m2 = jnp.max(t_logits, axis=-1, keepdims=True)
        sh2 = t_logits - m2
        lse2 = jnp.log(jnp.sum(jnp.exp(sh2), axis=-1, keepdims=True))
        s_lsm = sh2 - lse2

    teacher = teacher_ref[...].astype(jnp.float32)      # (TB, C) probabilities
    # PyTorch kl_div convention: contribution is exactly 0 where teacher == 0.
    safe_log_t = jnp.log(jnp.where(teacher > 0, teacher, 1.0))
    kl_row = jnp.sum(teacher * (safe_log_t - s_lsm), axis=-1, keepdims=True)

    partial = ((1.0 - alpha) * ce_row
               + (alpha * temperature * temperature) * kl_row)           # (TB,1)
    if need_mask:
        # Select (not multiply): garbage/NaN in out-of-bounds rows cannot leak.
        partial = jnp.where(_row_valid_mask(tile_b, batch_size), partial, 0.0)

    acc_ref[0, 0] += jnp.sum(partial)

    @pl.when(i == pl.num_programs(0) - 1)
    def _():
        out_ref[0, 0] = acc_ref[0, 0] * (1.0 / batch_size)


def _ce_kernel(logits_ref, targets_ref, out_ref, acc_ref, *,
               batch_size, tile_b, need_mask):
    i = pl.program_id(0)

    @pl.when(i == 0)
    def _():
        acc_ref[0, 0] = jnp.float32(0.0)

    logits = logits_ref[...].astype(jnp.float32)
    tgt = targets_ref[...]
    ce_row, _, _ = _ce_rows(logits, tgt)
    if need_mask:
        ce_row = jnp.where(_row_valid_mask(tile_b, batch_size), ce_row, 0.0)

    acc_ref[0, 0] += jnp.sum(ce_row)

    @pl.when(i == pl.num_programs(0) - 1)
    def _():
        out_ref[0, 0] = acc_ref[0, 0] * (1.0 / batch_size)


# ---------------------------------------------------------------------------
# Wrapper
# ---------------------------------------------------------------------------

_VMEM_TILE_BUDGET_BYTES = 8 << 20   # conservative; fits every gen's default
                                    # scoped-VMEM limit (16/32/32 MiB)


def _round_up(x, m):
    return -(-x // m) * m


def _choose_tile_b(batch, num_classes, n_big_inputs):
    # f32 bytes per batch row, counting double-buffered pipelining of each
    # (TB, C) input block.
    bytes_per_row = max(1, num_classes * 4 * n_big_inputs * 2)
    tb = _VMEM_TILE_BUDGET_BYTES // bytes_per_row
    # Keep the tile within the batch (rounded down to sublane multiple), but
    # never below the 8-row sublane granule.
    tb = min(tb, max(8, (batch // 8) * 8))
    tb = max(8, (tb // 8) * 8)
    return int(tb)


def distillation_loss(student_logits, hard_targets, teacher_soft_targets=None,
                      *, alpha: float = 0.5, temperature: float = 1.0,
                      tile_b: int = None):
    """Pallas TPU implementation of DistillationLoss.forward (returns f32 scalar)."""
    if not 0.0 <= alpha <= 1.0:
        raise ValueError(f"alpha must be between 0 and 1, but got {alpha}")

    B, C = student_logits.shape
    ce_only = teacher_soft_targets is None or alpha == 0.0
    n_big_inputs = 1 if ce_only else 2

    if tile_b is None:
        tile_b = _choose_tile_b(B, C, n_big_inputs)
    tile_b = max(8, (int(tile_b) // 8) * 8)

    num_tiles = pl.cdiv(B, tile_b)
    need_mask = (B % tile_b) != 0 or tile_b > B

    targets_col = hard_targets.astype(jnp.int32).reshape(B, 1)

    grid = (num_tiles,)
    out_shape = jax.ShapeDtypeStruct((1, 1), jnp.float32)
    block2d = pl.BlockSpec((tile_b, C), lambda i: (i, 0))
    block_tgt = pl.BlockSpec((tile_b, 1), lambda i: (i, 0))
    out_spec = pl.BlockSpec(memory_space=pltpu.MemorySpace.SMEM)
    scratch = [pltpu.SMEM((1, 1), jnp.float32)]
    compiler_params = pltpu.CompilerParams(dimension_semantics=("arbitrary",))

    if ce_only:
        kernel = functools.partial(_ce_kernel, batch_size=B, tile_b=tile_b,
                                   need_mask=need_mask)
        out = pl.pallas_call(
            kernel,
            out_shape=out_shape,
            grid=grid,
            in_specs=[block2d, block_tgt],
            out_specs=out_spec,
            scratch_shapes=scratch,
            compiler_params=compiler_params,
        )(student_logits, targets_col)
    else:
        kernel = functools.partial(_distill_kernel, alpha=float(alpha),
                                   temperature=float(temperature),
                                   batch_size=B, tile_b=tile_b,
                                   need_mask=need_mask)
        out = pl.pallas_call(
            kernel,
            out_shape=out_shape,
            grid=grid,
            in_specs=[block2d, block_tgt, block2d],
            out_specs=out_spec,
            scratch_shapes=scratch,
            compiler_params=compiler_params,
        )(student_logits, targets_col, teacher_soft_targets)

    return out[0, 0]


# ---------------------------------------------------------------------------
# Pure-JAX reference + tests
# ---------------------------------------------------------------------------

def _reference(student_logits, hard_targets, teacher_soft_targets,
               alpha, temperature):
    logits = student_logits.astype(jnp.float32)
    lsm = jax.nn.log_softmax(logits, axis=1)
    ce = -jnp.mean(jnp.take_along_axis(lsm, hard_targets[:, None], axis=1))
    if teacher_soft_targets is None or alpha == 0.0:
        return ce
    s_lsm = jax.nn.log_softmax(logits / temperature, axis=1)
    t = teacher_soft_targets.astype(jnp.float32)
    kl = jnp.sum(jnp.where(t > 0,
                           t * (jnp.log(jnp.where(t > 0, t, 1.0)) - s_lsm),
                           0.0))
    kl = kl / logits.shape[0] * temperature ** 2
    return (1.0 - alpha) * ce + alpha * kl


if __name__ == "__main__":
    key = jax.random.PRNGKey(0)
    k1, k2, k3, k4, k5, k6 = jax.random.split(key, 6)

    # --- Test 1: small problem, single grid step, T != 1 ---
    B, C = 8, 32
    alpha, temperature = 0.5, 2.0
    logits = jax.random.normal(k1, (B, C), dtype=jnp.float32)
    hard = jax.random.randint(k2, (B,), 0, C, dtype=jnp.int32)
    teacher = jax.nn.softmax(
        jax.random.normal(k3, (B, C), dtype=jnp.float32) / temperature, axis=1)

    got = jax.block_until_ready(
        distillation_loss(logits, hard, teacher,
                          alpha=alpha, temperature=temperature))
    ref = _reference(logits, hard, teacher, alpha, temperature)
    assert jnp.allclose(got, ref, rtol=1e-5, atol=1e-5), (got, ref)

    # --- Test 2: batch not a multiple of the tile (partial edge block, masked),
    #             multi-step grid, T == 1 (CE pass reused for KL) ---
    B2, C2 = 20, 128
    alpha2, temperature2 = 0.7, 1.0
    logits2 = jax.random.normal(k4, (B2, C2), dtype=jnp.float32)
    hard2 = jax.random.randint(k5, (B2,), 0, C2, dtype=jnp.int32)
    teacher2 = jax.nn.softmax(
        jax.random.normal(k6, (B2, C2), dtype=jnp.float32), axis=1)

    got2 = jax.block_until_ready(
        distillation_loss(logits2, hard2, teacher2,
                          alpha=alpha2, temperature=temperature2, tile_b=8))
    ref2 = _reference(logits2, hard2, teacher2, alpha2, temperature2)
    assert jnp.allclose(got2, ref2, rtol=1e-5, atol=1e-5), (got2, ref2)

    # --- Test 3: CE-only path (teacher is None), ragged batch, masked ---
    got3 = jax.block_until_ready(
        distillation_loss(logits2, hard2, None,
                          alpha=alpha2, temperature=temperature2, tile_b=8))
    ref3 = _reference(logits2, hard2, None, 0.0, temperature2)
    assert jnp.allclose(got3, ref3, rtol=1e-5, atol=1e-5), (got3, ref3)

    # --- Test 4: auto tile selection on ragged batch (tile > last block) ---
    got4 = jax.block_until_ready(
        distillation_loss(logits2, hard2, teacher2,
                          alpha=alpha2, temperature=temperature2))
    assert jnp.allclose(got4, ref2, rtol=1e-5, atol=1e-5), (got4, ref2)

    print("KERNEL_OK")
</pallas_src>

<mosaic_0001>
module attributes {stable_mosaic.version = 11 : i64} {
  func.func @_distill_kernel(%arg0: i32, %arg1: memref<8x32xf32, #tpu.memory_space<vmem>>, %arg2: memref<8x1xi32, #tpu.memory_space<vmem>>, %arg3: memref<8x32xf32, #tpu.memory_space<vmem>>, %arg4: memref<1x1xf32, #tpu.memory_space<smem>>, %arg5: memref<1x1xf32, #tpu.memory_space<smem>>) attributes {dimension_semantics = [#tpu.dimension_semantics<arbitrary>], iteration_bounds = array<i64: 1>, scalar_prefetch = 0 : i64, scratch_operands = 1 : i64, tpu.core_type = #tpu.core_type<tc>, window_params = [{transform_indices = @transform_0, window_bounds = array<i64: 8, 32>}, {transform_indices = @transform_1, window_bounds = array<i64: 8, 1>}, {transform_indices = @transform_2, window_bounds = array<i64: 8, 32>}, {transform_indices = @transform_3, window_bounds = array<i64: 1, 1>}]} {
    %c0_i32 = arith.constant 0 : i32
    %0 = arith.cmpi eq, %arg0, %c0_i32 : i32
    %1 = arith.extui %0 : i1 to i32
    %c0_i32_0 = arith.constant 0 : i32
    %2 = arith.cmpi ne, %1, %c0_i32_0 : i32
    scf.if %2 {
      %cst_24 = arith.constant 0.000000e+00 : f32
      %c0_25 = arith.constant 0 : index
      %c0_26 = arith.constant 0 : index
      %58 = memref.load %arg5[%c0_25, %c0_26] : memref<1x1xf32, #tpu.memory_space<smem>>
      memref.store %cst_24, %arg5[%c0_25, %c0_26] : memref<1x1xf32, #tpu.memory_space<smem>>
    } else {
    }
    %c0 = arith.constant 0 : index
    %c0_1 = arith.constant 0 : index
    %3 = vector.load %arg1[%c0, %c0_1] : memref<8x32xf32, #tpu.memory_space<vmem>>, vector<8x32xf32>
    %c0_2 = arith.constant 0 : index
    %c0_3 = arith.constant 0 : index
    %4 = vector.load %arg2[%c0_2, %c0_3] : memref<8x1xi32, #tpu.memory_space<vmem>>, vector<8x1xi32>
    %cst = arith.constant dense<0xFF800000> : vector<8xf32>
    %5 = vector.multi_reduction <maximumf>, %3, %cst [1] : vector<8x32xf32> to vector<8xf32>
    %6 = vector.shape_cast %5 : vector<8xf32> to vector<8x1xf32>
    %7 = vector.broadcast %6 : vector<8x1xf32> to vector<8x32xf32>
    %8 = arith.subf %3, %7 : vector<8x32xf32>
    %9 = math.exp %8 : vector<8x32xf32>
    %cst_4 = arith.constant dense<0.000000e+00> : vector<8xf32>
    %10 = vector.multi_reduction <add>, %9, %cst_4 [1] : vector<8x32xf32> to vector<8xf32>
    %11 = vector.shape_cast %10 : vector<8xf32> to vector<8x1xf32>
    %12 = math.log %11 : vector<8x1xf32>
    %13 = tpu.iota {dimensions = array<i32: 1>} : vector<8x32xi32>
    %14 = vector.broadcast %4 : vector<8x1xi32> to vector<8x32xi32>
    %15 = arith.cmpi eq, %13, %14 : vector<8x32xi32>
    %cst_5 = arith.constant 0.000000e+00 : f32
    %16 = vector.broadcast %cst_5 : f32 to vector<8x32xf32>
    %17 = arith.select %15, %8, %16 : vector<8x32xi1>, vector<8x32xf32>
    %cst_6 = arith.constant dense<0.000000e+00> : vector<8xf32>
    %18 = vector.multi_reduction <add>, %17, %cst_6 [1] : vector<8x32xf32> to vector<8xf32>
    %19 = vector.shape_cast %18 : vector<8xf32> to vector<8x1xf32>
    %20 = arith.subf %12, %19 : vector<8x1xf32>
    %cst_7 = arith.constant 5.000000e-01 : f32
    %21 = vector.broadcast %cst_7 : f32 to vector<8x32xf32>
    %22 = arith.mulf %3, %21 : vector<8x32xf32>
    %cst_8 = arith.constant dense<0xFF800000> : vector<8xf32>
    %23 = vector.multi_reduction <maximumf>, %22, %cst_8 [1] : vector<8x32xf32> to vector<8xf32>
    %24 = vector.shape_cast %23 : vector<8xf32> to vector<8x1xf32>
    %25 = vector.broadcast %24 : vector<8x1xf32> to vector<8x32xf32>
    %26 = arith.subf %22, %25 : vector<8x32xf32>
    %27 = math.exp %26 : vector<8x32xf32>
    %cst_9 = arith.constant dense<0.000000e+00> : vector<8xf32>
    %28 = vector.multi_reduction <add>, %27, %cst_9 [1] : vector<8x32xf32> to vector<8xf32>
    %29 = vector.shape_cast %28 : vector<8xf32> to vector<8x1xf32>
    %30 = math.log %29 : vector<8x1xf32>
    %31 = vector.broadcast %30 : vector<8x1xf32> to vector<8x32xf32>
    %32 = arith.subf %26, %31 : vector<8x32xf32>
    %c0_10 = arith.constant 0 : index
    %c0_11 = arith.constant 0 : index
    %33 = vector.load %arg3[%c0_10, %c0_11] : memref<8x32xf32, #tpu.memory_space<vmem>>, vector<8x32xf32>
    %cst_12 = arith.constant 0.000000e+00 : f32
    %34 = vector.broadcast %cst_12 : f32 to vector<8x32xf32>
    %35 = arith.cmpf ogt, %33, %34 : vector<8x32xf32>
    %cst_13 = arith.constant 1.000000e+00 : f32
    %36 = vector.broadcast %cst_13 : f32 to vector<8x32xf32>
    %37 = arith.select %35, %33, %36 : vector<8x32xi1>, vector<8x32xf32>
    %38 = math.log %37 : vector<8x32xf32>
    %39 = arith.subf %38, %32 : vector<8x32xf32>
    %40 = arith.mulf %33, %39 : vector<8x32xf32>
    %cst_14 = arith.constant dense<0.000000e+00> : vector<8xf32>
    %41 = vector.multi_reduction <add>, %40, %cst_14 [1] : vector<8x32xf32> to vector<8xf32>
    %42 = vector.shape_cast %41 : vector<8xf32> to vector<8x1xf32>
    %cst_15 = arith.constant 5.000000e-01 : f32
    %43 = vector.broadcast %cst_15 : f32 to vector<8x1xf32>
    %44 = arith.mulf %43, %20 : vector<8x1xf32>
    %cst_16 = arith.constant 2.000000e+00 : f32
    %45 = vector.broadcast %cst_16 : f32 to vector<8x1xf32>
    %46 = arith.mulf %45, %42 : vector<8x1xf32>
    %47 = arith.addf %44, %46 : vector<8x1xf32>
    %c0_17 = arith.constant 0 : index
    %c0_18 = arith.constant 0 : index
    %48 = memref.load %arg5[%c0_17, %c0_18] : memref<1x1xf32, #tpu.memory_space<smem>>
    %49 = vector.shape_cast %47 : vector<8x1xf32> to vector<1x8x1xf32>
    %cst_19 = arith.constant dense<0.000000e+00> : vector<1xf32>
    %50 = vector.multi_reduction <add>, %49, %cst_19 [1, 2] : vector<1x8x1xf32> to vector<1xf32>
    %51 = vector.shape_cast %50 : vector<1xf32> to vector<1x1x1xf32>
    %52 = vector.extract %51[0, 0, 0] : f32 from vector<1x1x1xf32>
    %53 = arith.addf %48, %52 : f32
    %c0_20 = arith.constant 0 : index
    %c0_21 = arith.constant 0 : index
    %54 = memref.load %arg5[%c0_20, %c0_21] : memref<1x1xf32, #tpu.memory_space<smem>>
    memref.store %53, %arg5[%c0_20, %c0_21] : memref<1x1xf32, #tpu.memory_space<smem>>
    %c0_i32_22 = arith.constant 0 : i32
    %55 = arith.cmpi eq, %arg0, %c0_i32_22 : i32
    %56 = arith.extui %55 : i1 to i32
    %c0_i32_23 = arith.constant 0 : i32
    %57 = arith.cmpi ne, %56, %c0_i32_23 : i32
    scf.if %57 {
      %c0_24 = arith.constant 0 : index
      %c0_25 = arith.constant 0 : index
      %58 = memref.load %arg5[%c0_24, %c0_25] : memref<1x1xf32, #tpu.memory_space<smem>>
      %cst_26 = arith.constant 1.250000e-01 : f32
      %59 = arith.mulf %58, %cst_26 : f32
      %c0_27 = arith.constant 0 : index
      %c0_28 = arith.constant 0 : index
      %60 = memref.load %arg4[%c0_27, %c0_28] : memref<1x1xf32, #tpu.memory_space<smem>>
      memref.store %59, %arg4[%c0_27, %c0_28] : memref<1x1xf32, #tpu.memory_space<smem>>
    } else {
    }
    return
  }
  func.func @transform_0(%arg0: i32) -> (i32, i32) {
    %c0_i32 = arith.constant 0 : i32
    %c0_i32_0 = arith.constant 0 : i32
    return %arg0, %c0_i32 : i32, i32
  }
  func.func @transform_1(%arg0: i32) -> (i32, i32) {
    %c0_i32 = arith.constant 0 : i32
    %c0_i32_0 = arith.constant 0 : i32
    return %arg0, %c0_i32 : i32, i32
  }
  func.func @transform_2(%arg0: i32) -> (i32, i32) {
    %c0_i32 = arith.constant 0 : i32
    %c0_i32_0 = arith.constant 0 : i32
    return %arg0, %c0_i32 : i32, i32
  }
  func.func @transform_3(%arg0: i32) -> (i32, i32) {
    %c0_i32 = arith.constant 0 : i32
    %c0_i32_0 = arith.constant 0 : i32
    %c0_i32_1 = arith.constant 0 : i32
    return %c0_i32, %c0_i32_0 : i32, i32
  }
}

</mosaic_0001>

<bundles_post_ra>
// kernel: tpu_custom_call.1
= control target key start
LH: loop header
LB: loop body
LE: loop exit
PB: predicated region body
PF: predicated region fallthrough
CT: control target
= control target key end

     0   :  { %8 = vsyncpa [#allocation4], 0  ;;  %s210_s0 = inlined_call_operand.vmem [shape: f32[8,32], index: 0, kind: input, shape index: {}]   ;;  %s211_s1 = inlined_call_operand.vmem [shape: s32[8,1], index: 1, kind: input, shape index: {}]   ;;  %s212_s2 = inlined_call_operand.hbm [shape: f32[8,32], index: 2, kind: input, shape index: {}]   ;;  %s213_s3 = inlined_call_operand.hbm [shape: f32[1,1], index: 3, kind: output, shape index: {}]  }
   0x1   :  { %9 = vsyncpa [#allocation5], 0  ;;  %s169_s12 = smov [#allocation3]  }
   0x2   :  { %s20_s13 = sshll.u32 %s169_s12, 4  ;;  %s21_s13 = int_to_ptr.vmem [resolvable:$true] %s20_s13 }
   0x3   :  { %s145_s14 = scalar_lea.vmem %s21_s13, 128  ;;  %p150_p1 = scmp.lt.s32.totalorder %s21_s13, %s21_s13 }
   0x4   :  { %p146_p0 = scmp.ne.s32.totalorder %s21_s13, %s145_s14  ;;  %p151_p2 = scmp.lt.s32.totalorder %s145_s14, %s145_s14 }
   0x6   :  { %p152_p3 = por %p151_p2, %p150_p1 }
   0x8   :  { %p153_p4 = pnand %p152_p3, %p146_p0 }
   0xa   :  { %156 = shalt.err (!%p153_p4)
}
   0xb   :  { %23 = dma.hbm_to_vmem [thread:$0]  %s212_s2, 128, %s21_s13, [#allocation4]  }
   0xc   :  { %165 = dma.done.wait [#allocation4], 128  }
   0xd   :  { %166 = vsyncadd [#allocation4], 4294967168  ;;  %v33_v0 = vld [vmem:[%s210_s0] sm:$0xff]  ;;  %vm35_vm0 = vcmask 261120   ;;  %v170_v4 = vmov 0   ;;  %v47_v18 = vlaneseq  ;;  %vm85_vm3 = vcmask 7168  }
   0xe   :  { %v58_v1 = vmul.f32 0.5, %v33_v0  ;;  %v36_v3 = vsel %vm35_vm0, %v33_v0, -inf  ;;  %125 = vset.pattern.permute.xlu1 %v170_v4  ;;  %126 = vset.pattern.permute.xlu0 %v170_v4  ;;  %v34_v15 = vld [vmem:[%s211_s1] sm:$0xff]  ;;  %s171_s20 = smov [#allocation6]  }
   0xf   :  { %v71_v16 = vld [vmem:[#allocation3] sm:$0xff]  ;;  %v48_v20 = vand.u32 127, %v47_v18 }
  0x10   :  { %v59_v2 = vsel %vm35_vm0, %v58_v1, -inf  ;;  %vm72_vm1 = vcmp.gt.f32.partialorder %v71_v16, 0.0 }
  0x11   :  { %60 = vmax.xlane.f32.xlu0 %v59_v2  ;;  %v73_v17 = vsel %vm72_vm1, %v71_v16, 1.0 }
  0x15   :  { %37 = vmax.xlane.f32.xlu0 %v36_v3 }
  0x9a   :  { %v61_v5 = vpop.xlane.xlu0 %60 }
  0x9b   :  { %v62_v6 = vsub.f32 %v58_v1, %v61_v5 }
  0x9d   :  { %v63_v7 = vmul.f32 1.442695, %v62_v6 }
  0x9e   :  { %v38_v8 = vpop.xlane.xlu0 %37 }
  0x9f   :  { %127 = vpow2.f32 %v63_v7  ;;  %v39_v9 = vsub.f32 %v33_v0, %v38_v8 }
  0xa1   :  { %v40_v10 = vmul.f32 1.442695, %v39_v9 }
  0xa3   :  { %129 = vpow2.f32 %v40_v10 }
  0xa4   :  { %131 = vlog2.f32 %v73_v17 }
  0xac   :  { %v128_v11 = vpop.eup %127 }
  0xad   :  { %v65_v12 = vsel %vm35_vm0, %v128_v11, 0.0 }
  0xae   :  { %66 = vadd.xlane.f32.xlu1 %v65_v12 }
  0xb0   :  { %v130_v13 = vpop.eup %129 }
  0xb1   :  { %v42_v14 = vsel %vm35_vm0, %v130_v13, 0.0  ;;  %v132_v24 = vpop.eup %131 }
  0xb2   :  { %43 = vadd.xlane.f32.xlu0 %v42_v14  ;;  %v75_v27 = vmul.f32 0.6931472, %v132_v24 }
  0xbf   :  { %50 = vperm.xlu1 %125, %v34_v15  }
 0x137   :  { %v67_v19 = vpop.xlane.xlu1 %66 }
 0x138   :  { %133 = vlog2.f32 %v67_v19 }
 0x13b   :  { %v51_v21 = vpop.permute.xlu1 %50  ;;  %v44_v32 = vpop.xlane.xlu0 %43 }
 0x13c   :  { %vm52_vm2 = vcmp.eq.s32.totalorder %v48_v20, %v51_v21  ;;  %135 = vlog2.f32 %v44_v32 }
 0x13d   :  { %v53_v22 = vsel %vm52_vm2, %v39_v9, 0.0 }
 0x13e   :  { %v54_v23 = vsel %vm35_vm0, %v53_v22, 0.0 }
 0x13f   :  { %55 = vadd.xlane.f32.xlu0 %v54_v23 }
 0x145   :  { %v134_v25 = vpop.eup %133 }
 0x146   :  { %v69_v26 = vmul.f32 0.6931472, %v134_v25 }
 0x148   :  { %v70_v28 = vsub.f32 %v62_v6, %v69_v26 }
 0x149   :  { %v136_v33 = vpop.eup %135 }
 0x14a   :  { %v76_v29 = vsub.f32 %v75_v27, %v70_v28  ;;  %v46_v34 = vmul.f32 0.6931472, %v136_v33 }
 0x14c   :  { %v77_v30 = vmul.f32 %v76_v29, %v71_v16 }
 0x14e   :  { %v78_v31 = vsel %vm35_vm0, %v77_v30, 0.0 }
 0x14f   :  { %79 = vadd.xlane.f32.xlu0 %v78_v31 }
 0x1c8   :  { %v56_v35 = vpop.xlane.xlu0 %55 }
 0x1c9   :  { %v57_v36 = vsub.f32 %v46_v34, %v56_v35 }
 0x1cb   :  { %v81_v38 = vmul.f32 0.5, %v57_v36 }
 0x1d8   :  { %v80_v37 = vpop.xlane.xlu0 %79 }
 0x1d9   :  { %v82_v39 = vmul.f32 2.0, %v80_v37 }
 0x1db   :  { %v83_v40 = vadd.f32 %v82_v39, %v81_v38 }
 0x1dd   :  { %v86_v41 = vsel %vm85_vm3, %v83_v40, 0.0 }
 0x1de   :  { %87 = vadd.xlane.f32.xlu0 %v86_v41 }
 0x267   :  { %v88_v42 = vpop.xlane.xlu0 %87 }
 0x268   :  { %v89_v43 = vrot.slane %v88_v42, 4 }
 0x26a   :  { %v90_v44 = vadd.f32 %v89_v43, %v88_v42 }
 0x26c   :  { %v91_v45 = vrot.slane %v90_v44, 2 }
 0x26e   :  { %v92_v46 = vadd.f32 %v91_v45, %v90_v44 }
 0x270   :  { %v93_v47 = vrot.slane %v92_v46, 1 }
 0x272   :  { %v94_v48 = vadd.f32 %v93_v47, %v92_v46 }
 0x274   :  { %120 = vpush %v94_v48 }
 0x2a5   :  { %s121_s1 = spop %120 }
 0x2a6   :  { %s103_s19 = smul.f32 0.125, %s121_s1 }
 0x2a8   :  { %105 = sst [smem:[#allocation6]] %s103_s19 }
 0x2a9   :  { %113 = dma.smem_to_hbm %s171_s20, 16, %s213_s3, [#allocation5]  }
 0x2aa   :  { %167 = dma.done.wait [#allocation5], 16  }
 0x2ab   :  { %168 = vsyncadd [#allocation5], 4294967280 }
 0x2ac   :  { %117 = sfence }
 0x2ad   :  { %118 = vsyncpa [#allocation4], 1 }
 0x2ae   :  { %119 = vsyncpa [#allocation5], 1 }

</bundles_post_ra>
